<compile_context>
chip_gen: v5e
topology: v5e:2x2
jax: 0.10.0
libtpu: 0.0.40
codegen_flags: <defaults>
</compile_context>

<pallas_src>
import functools

import jax
import jax.numpy as jnp
from jax.experimental import pallas as pl
from jax.experimental.pallas import tpu as pltpu


def _round_up(n, m):
    return (n + m - 1) // m * m


def ffn_kernel(x_ref, w1_ref, b1_ref, w2_ref, b2_ref, w3_ref, b3_ref, o_ref):
    """Three fused (dot + bias + SiLU) stages. BN is pre-folded into W/b."""

    def layer(h, w_ref, b_ref):
        z = jnp.dot(h, w_ref[...], preferred_element_type=jnp.float32)
        z = z + b_ref[...]
        # SiLU(z) = z * sigmoid(z) = 0.5 * z * (1 + tanh(z/2)):
        # a single EUP push per element; tanh runs in the compute dtype
        # (bf16 on v6e/v7x by default, f32 when compute_dtype == f32).
        t = jnp.tanh((0.5 * z).astype(w_ref.dtype))
        return 0.5 * z * (1.0 + t.astype(jnp.float32))

    h = layer(x_ref[...].astype(w1_ref.dtype), w1_ref, b1_ref)
    h = layer(h.astype(w2_ref.dtype), w2_ref, b2_ref)
    h = layer(h.astype(w3_ref.dtype), w3_ref, b3_ref)
    o_ref[...] = h.astype(o_ref.dtype)


def _fold_bn(gamma, beta, mean, var, eps=1e-5):
    """Inference BatchNorm1d -> per-feature (scale, shift), 1-D."""
    scale = gamma / jnp.sqrt(var + eps)
    shift = beta - mean * scale
    return scale.astype(jnp.float32), shift.astype(jnp.float32)


def _pick_batch_tile(n, batch_tile):
    """Largest tile <= batch_tile, but aim for >= 2 grid steps (v7x: 2 TCs)."""
    if n > batch_tile:
        return batch_tile
    tile = max(8, _round_up(-(-n // 2), 8))   # ceil(n/2) rounded up to 8
    if tile >= n:
        return n           # single full-array block (block == array dim is legal)
    return tile


@functools.partial(jax.jit, static_argnames=("batch_tile", "compute_dtype"))
def feature_ffn_forward(x, params, batch_tile=1024, compute_dtype=jnp.bfloat16):
    """x: (N, inputCount) float32 -> (N, hidden[-1]) float32 (eval-mode)."""
    assert batch_tile % 8 == 0 and batch_tile > 0
    cdt = jnp.dtype(compute_dtype)
    N, Fin = x.shape

    # ---- fold BN0..BN3 into the three Linear layers (one-time, wrapper) -----
    s0, t0 = _fold_bn(*params["bn0"])
    w1, b1 = params["dense1"]
    s1, t1 = _fold_bn(*params["bn1"])
    w2, b2 = params["dense2"]
    s2, t2 = _fold_bn(*params["bn2"])
    w3, b3 = params["dense3"]
    s3, t3 = _fold_bn(*params["bn3"])

    W1 = (s0[:, None] * w1) * s1[None, :]
    B1 = (t0 @ w1 + b1) * s1 + t1
    W2 = w2 * s2[None, :]
    B2 = b2 * s2 + t2
    W3 = w3 * s3[None, :]
    B3 = b3 * s3 + t3

    H1, H2, H3 = w1.shape[1], w2.shape[1], w3.shape[1]
    P1, P2, P3 = (_round_up(h, 128) for h in (H1, H2, H3))

    # Zero-pad only the matmul OUTPUT dims to multiples of 128 (lane-dense
    # stores).  Contraction dims: layer 1 keeps K = Fin so x stays untouched
    # in HBM; layers 2/3 use the already-padded P1/P2 (padded activation
    # columns are exactly 0 since the padded weight columns and biases are 0).
    def pad_w(w, p_in, p_out):
        return jnp.pad(
            w, ((0, p_in - w.shape[0]), (0, p_out - w.shape[1]))).astype(cdt)

    def pad_b(b, p):
        return jnp.pad(b, (0, p - b.shape[0]))[None, :].astype(jnp.float32)

    W1p = pad_w(W1, Fin, P1)
    W2p = pad_w(W2, P1, P2)
    W3p = pad_w(W3, P2, P3)
    B1p, B2p, B3p = pad_b(B1, P1), pad_b(B2, P2), pad_b(B3, P3)

    # ---- batch tiling: ragged 1-D grid over N, no wrapper padding of x ------
    tile = _pick_batch_tile(N, batch_tile)
    grid = (pl.cdiv(N, tile),)

    def const_spec(shape):
        # whole-array block, same block every grid step (resident constant)
        return pl.BlockSpec(shape, lambda i: (0, 0))

    # Rough per-step VMEM estimate (double-buffered x/out + resident weights +
    # f32 intermediates).  Only raise the scoped-VMEM limit when v5e's 16 MiB
    # default could be exceeded; keep it well under v7x's 64 MiB physical VMEM.
    est = (2 * tile * Fin * x.dtype.itemsize
           + 2 * tile * P3 * cdt.itemsize
           + 2 * cdt.itemsize * (Fin * P1 + P1 * P2 + P2 * P3)
           + 4 * tile * max(P1, P2, P3) * 4)
    vmem_limit = (int(min(2 * est, 48 * 1024 * 1024))
                  if est > 12 * 1024 * 1024 else None)

    out = pl.pallas_call(
        ffn_kernel,
        out_shape=jax.ShapeDtypeStruct((N, P3), cdt),
        grid_spec=pltpu.PrefetchScalarGridSpec(
            num_scalar_prefetch=0,
            grid=grid,
            in_specs=[
                pl.BlockSpec((tile, Fin), lambda i: (i, 0)),   # x tile (raw f32)
                const_spec((Fin, P1)), const_spec((1, P1)),    # layer 1
                const_spec((P1, P2)), const_spec((1, P2)),     # layer 2
                const_spec((P2, P3)), const_spec((1, P3)),     # layer 3
            ],
            out_specs=pl.BlockSpec((tile, P3), lambda i: (i, 0)),
        ),
        compiler_params=pltpu.CompilerParams(
            dimension_semantics=("parallel",),
            vmem_limit_bytes=vmem_limit,
        ),
    )(x, W1p, B1p, W2p, B2p, W3p, B3p)

    # Slice off the padded feature lanes and restore the module's f32 output
    # dtype (fuses into a single XLA copy).  Consumers that can read the
    # padded bf16 slab directly should use `out` and skip this pass.
    return out[:, :H3].astype(jnp.float32)


def init_params(key, input_count=130, hidden=(150, 150, 150), output_count=5):
    """Deterministic synthetic parameters matching FeatureFFN.__init__ shapes."""
    ks = jax.random.split(key, 16)
    k = iter(ks)

    def linear(kk, fin, fout):
        # PyTorch stores (fout, fin); we store transposed (fin, fout) for h @ W.
        bound = 1.0 / jnp.sqrt(fin)
        w = jax.random.uniform(kk, (fin, fout), jnp.float32, -bound, bound)
        b = jax.random.uniform(jax.random.fold_in(kk, 1), (fout,), jnp.float32,
                               -bound, bound)
        return w, b

    def bn(kk, f):
        gamma = 1.0 + 0.1 * jax.random.normal(kk, (f,), jnp.float32)
        beta = 0.1 * jax.random.normal(jax.random.fold_in(kk, 1), (f,), jnp.float32)
        mean = 0.05 * jax.random.normal(jax.random.fold_in(kk, 2), (f,), jnp.float32)
        var = 1.0 + 0.1 * jax.random.uniform(jax.random.fold_in(kk, 3), (f,),
                                             jnp.float32)
        return gamma, beta, mean, var

    params = {
        "bn0": bn(next(k), input_count),
        "dense1": linear(next(k), input_count, hidden[0]),
        "bn1": bn(next(k), hidden[0]),
        "dense2": linear(next(k), hidden[0], hidden[1]),
        "bn2": bn(next(k), hidden[1]),
        "dense3": linear(next(k), hidden[1], hidden[2]),
        "bn3": bn(next(k), hidden[2]),
        # present in __init__ but unused in forward()
        "outDense": linear(next(k), hidden[2], output_count),
    }
    return params


def reference_forward(x, params):
    """Pure-JAX reference for correctness checking (eval-mode)."""
    def bn_apply(h, p):
        s, t = _fold_bn(*p)
        return h * s[None, :] + t[None, :]

    h = bn_apply(x, params["bn0"])
    for dname, bname in (("dense1", "bn1"), ("dense2", "bn2"), ("dense3", "bn3")):
        w, b = params[dname]
        h = bn_apply(h @ w + b[None, :], params[bname])
        h = h * jax.nn.sigmoid(h)
    return h


if __name__ == "__main__":
    key = jax.random.PRNGKey(0)
    kp, kx = jax.random.split(key)

    INPUT_COUNT = 130
    HIDDEN = (150, 150, 150)
    N = 19  # deliberately not tile-aligned: exercises the ragged last block

    params = init_params(kp, INPUT_COUNT, HIDDEN, output_count=5)
    x = jax.random.normal(kx, (N, INPUT_COUNT), jnp.float32)

    ref = reference_forward(x, params)

    # f32 compute path: tight check (tanh-form SiLU is exactly z*sigmoid(z)).
    out_f32 = jax.block_until_ready(
        feature_ffn_forward(x, params, compute_dtype=jnp.float32))
    assert out_f32.shape == (N, HIDDEN[-1]), out_f32.shape
    assert jnp.allclose(out_f32, ref, atol=2e-3, rtol=2e-3), "f32 path mismatch"

    # default bf16-operand MXU path: looser tolerance for bf16 rounding.
    out = jax.block_until_ready(feature_ffn_forward(x, params))
    assert out.shape == (N, HIDDEN[-1]), out.shape
    assert jnp.allclose(out, ref, atol=1e-1, rtol=1e-1), "bf16 path mismatch"

    print("KERNEL_OK")
</pallas_src>

<mosaic_0001>
module attributes {stable_mosaic.version = 11 : i64} {
  func.func @ffn_kernel(%arg0: i32, %arg1: memref<16x130xf32, #tpu.memory_space<vmem>>, %arg2: memref<130x256xf32, #tpu.memory_space<vmem>>, %arg3: memref<1x256xf32, #tpu.memory_space<vmem>>, %arg4: memref<256x256xf32, #tpu.memory_space<vmem>>, %arg5: memref<1x256xf32, #tpu.memory_space<vmem>>, %arg6: memref<256x256xf32, #tpu.memory_space<vmem>>, %arg7: memref<1x256xf32, #tpu.memory_space<vmem>>, %arg8: memref<16x256xf32, #tpu.memory_space<vmem>>) attributes {dimension_semantics = [#tpu.dimension_semantics<parallel>], iteration_bounds = array<i64: 2>, scalar_prefetch = 0 : i64, scratch_operands = 0 : i64, tpu.core_type = #tpu.core_type<tc>, window_params = [{transform_indices = @transform_0, window_bounds = array<i64: 16, 130>}, {pipeline_mode = #tpu.pipeline_mode<synchronous>, transform_indices = @transform_1, window_bounds = array<i64: 130, 256>}, {pipeline_mode = #tpu.pipeline_mode<synchronous>, transform_indices = @transform_2, window_bounds = array<i64: 1, 256>}, {pipeline_mode = #tpu.pipeline_mode<synchronous>, transform_indices = @transform_3, window_bounds = array<i64: 256, 256>}, {pipeline_mode = #tpu.pipeline_mode<synchronous>, transform_indices = @transform_4, window_bounds = array<i64: 1, 256>}, {pipeline_mode = #tpu.pipeline_mode<synchronous>, transform_indices = @transform_5, window_bounds = array<i64: 256, 256>}, {pipeline_mode = #tpu.pipeline_mode<synchronous>, transform_indices = @transform_6, window_bounds = array<i64: 1, 256>}, {transform_indices = @transform_7, window_bounds = array<i64: 16, 256>}]} {
    %c0 = arith.constant 0 : index
    %c0_0 = arith.constant 0 : index
    %0 = vector.load %arg1[%c0, %c0_0] : memref<16x130xf32, #tpu.memory_space<vmem>>, vector<16x130xf32>
    %c0_1 = arith.constant 0 : index
    %c0_2 = arith.constant 0 : index
    %1 = vector.load %arg2[%c0_1, %c0_2] : memref<130x256xf32, #tpu.memory_space<vmem>>, vector<130x256xf32>
    %cst = arith.constant dense<0.000000e+00> : vector<16x256xf32>
    %2 = tpu.matmul %0, %1, %cst {dimension_numbers = #tpu.dot_dimension_numbers<[1], [0], [0], [1], [0, 0, 1, 1], [], []>} : vector<16x130xf32>, vector<130x256xf32>, vector<16x256xf32> -> vector<16x256xf32>
    %c0_3 = arith.constant 0 : index
    %c0_4 = arith.constant 0 : index
    %3 = vector.load %arg3[%c0_3, %c0_4] : memref<1x256xf32, #tpu.memory_space<vmem>>, vector<1x256xf32>
    %4 = vector.broadcast %3 : vector<1x256xf32> to vector<16x256xf32>
    %5 = arith.addf %2, %4 : vector<16x256xf32>
    %cst_5 = arith.constant 5.000000e-01 : f32
    %6 = vector.broadcast %cst_5 : f32 to vector<16x256xf32>
    %7 = arith.mulf %6, %5 : vector<16x256xf32>
    %8 = math.tanh %7 : vector<16x256xf32>
    %cst_6 = arith.constant 5.000000e-01 : f32
    %9 = vector.broadcast %cst_6 : f32 to vector<16x256xf32>
    %10 = arith.mulf %9, %5 : vector<16x256xf32>
    %cst_7 = arith.constant 1.000000e+00 : f32
    %11 = vector.broadcast %cst_7 : f32 to vector<16x256xf32>
    %12 = arith.addf %11, %8 : vector<16x256xf32>
    %13 = arith.mulf %10, %12 : vector<16x256xf32>
    %c0_8 = arith.constant 0 : index
    %c0_9 = arith.constant 0 : index
    %14 = vector.load %arg4[%c0_8, %c0_9] : memref<256x256xf32, #tpu.memory_space<vmem>>, vector<256x256xf32>
    %cst_10 = arith.constant dense<0.000000e+00> : vector<16x256xf32>
    %15 = tpu.matmul %13, %14, %cst_10 {dimension_numbers = #tpu.dot_dimension_numbers<[1], [0], [0], [1], [0, 0, 1, 1], [], []>} : vector<16x256xf32>, vector<256x256xf32>, vector<16x256xf32> -> vector<16x256xf32>
    %c0_11 = arith.constant 0 : index
    %c0_12 = arith.constant 0 : index
    %16 = vector.load %arg5[%c0_11, %c0_12] : memref<1x256xf32, #tpu.memory_space<vmem>>, vector<1x256xf32>
    %17 = vector.broadcast %16 : vector<1x256xf32> to vector<16x256xf32>
    %18 = arith.addf %15, %17 : vector<16x256xf32>
    %cst_13 = arith.constant 5.000000e-01 : f32
    %19 = vector.broadcast %cst_13 : f32 to vector<16x256xf32>
    %20 = arith.mulf %19, %18 : vector<16x256xf32>
    %21 = math.tanh %20 : vector<16x256xf32>
    %cst_14 = arith.constant 5.000000e-01 : f32
    %22 = vector.broadcast %cst_14 : f32 to vector<16x256xf32>
    %23 = arith.mulf %22, %18 : vector<16x256xf32>
    %cst_15 = arith.constant 1.000000e+00 : f32
    %24 = vector.broadcast %cst_15 : f32 to vector<16x256xf32>
    %25 = arith.addf %24, %21 : vector<16x256xf32>
    %26 = arith.mulf %23, %25 : vector<16x256xf32>
    %c0_16 = arith.constant 0 : index
    %c0_17 = arith.constant 0 : index
    %27 = vector.load %arg6[%c0_16, %c0_17] : memref<256x256xf32, #tpu.memory_space<vmem>>, vector<256x256xf32>
    %cst_18 = arith.constant dense<0.000000e+00> : vector<16x256xf32>
    %28 = tpu.matmul %26, %27, %cst_18 {dimension_numbers = #tpu.dot_dimension_numbers<[1], [0], [0], [1], [0, 0, 1, 1], [], []>} : vector<16x256xf32>, vector<256x256xf32>, vector<16x256xf32> -> vector<16x256xf32>
    %c0_19 = arith.constant 0 : index
    %c0_20 = arith.constant 0 : index
    %29 = vector.load %arg7[%c0_19, %c0_20] : memref<1x256xf32, #tpu.memory_space<vmem>>, vector<1x256xf32>
    %30 = vector.broadcast %29 : vector<1x256xf32> to vector<16x256xf32>
    %31 = arith.addf %28, %30 : vector<16x256xf32>
    %cst_21 = arith.constant 5.000000e-01 : f32
    %32 = vector.broadcast %cst_21 : f32 to vector<16x256xf32>
    %33 = arith.mulf %32, %31 : vector<16x256xf32>
    %34 = math.tanh %33 : vector<16x256xf32>
    %cst_22 = arith.constant 5.000000e-01 : f32
    %35 = vector.broadcast %cst_22 : f32 to vector<16x256xf32>
    %36 = arith.mulf %35, %31 : vector<16x256xf32>
    %cst_23 = arith.constant 1.000000e+00 : f32
    %37 = vector.broadcast %cst_23 : f32 to vector<16x256xf32>
    %38 = arith.addf %37, %34 : vector<16x256xf32>
    %39 = arith.mulf %36, %38 : vector<16x256xf32>
    %c0_24 = arith.constant 0 : index
    %c0_25 = arith.constant 0 : index
    %40 = vector.load %arg8[%c0_24, %c0_25] : memref<16x256xf32, #tpu.memory_space<vmem>>, vector<16x256xf32>
    tpu.vector_store %arg8[%c0_24, %c0_25], %39 {strides = array<i32>} : memref<16x256xf32, #tpu.memory_space<vmem>>, vector<16x256xf32>,
    return
  }
  func.func @transform_0(%arg0: i32) -> (i32, i32) {
    %c0_i32 = arith.constant 0 : i32
    %c0_i32_0 = arith.constant 0 : i32
    return %arg0, %c0_i32 : i32, i32
  }
  func.func @transform_1(%arg0: i32) -> (i32, i32) {
    %c0_i32 = arith.constant 0 : i32
    %c0_i32_0 = arith.constant 0 : i32
    %c0_i32_1 = arith.constant 0 : i32
    return %c0_i32, %c0_i32_0 : i32, i32
  }
  func.func @transform_2(%arg0: i32) -> (i32, i32) {
    %c0_i32 = arith.constant 0 : i32
    %c0_i32_0 = arith.constant 0 : i32
    %c0_i32_1 = arith.constant 0 : i32
    return %c0_i32, %c0_i32_0 : i32, i32
  }
  func.func @transform_3(%arg0: i32) -> (i32, i32) {
    %c0_i32 = arith.constant 0 : i32
    %c0_i32_0 = arith.constant 0 : i32
    %c0_i32_1 = arith.constant 0 : i32
    return %c0_i32, %c0_i32_0 : i32, i32
  }
  func.func @transform_4(%arg0: i32) -> (i32, i32) {
    %c0_i32 = arith.constant 0 : i32
    %c0_i32_0 = arith.constant 0 : i32
    %c0_i32_1 = arith.constant 0 : i32
    return %c0_i32, %c0_i32_0 : i32, i32
  }
  func.func @transform_5(%arg0: i32) -> (i32, i32) {
    %c0_i32 = arith.constant 0 : i32
    %c0_i32_0 = arith.constant 0 : i32
    %c0_i32_1 = arith.constant 0 : i32
    return %c0_i32, %c0_i32_0 : i32, i32
  }
  func.func @transform_6(%arg0: i32) -> (i32, i32) {
    %c0_i32 = arith.constant 0 : i32
    %c0_i32_0 = arith.constant 0 : i32
    %c0_i32_1 = arith.constant 0 : i32
    return %c0_i32, %c0_i32_0 : i32, i32
  }
  func.func @transform_7(%arg0: i32) -> (i32, i32) {
    %c0_i32 = arith.constant 0 : i32
    %c0_i32_0 = arith.constant 0 : i32
    return %arg0, %c0_i32 : i32, i32
  }
}

</mosaic_0001>

<bundles_post_ra>
// kernel: feature_ffn_forward.1
= control target key start
LH: loop header
LB: loop body
LE: loop exit
PB: predicated region body
PF: predicated region fallthrough
CT: control target
= control target key end

     0   :  { %12 = vsyncpa [#allocation3], 0  ;;  %s1815_s0 = inlined_call_operand.vmem [shape: f32[19,130], index: 0, kind: input, shape index: {}]   ;;  %s1816_s1 = inlined_call_operand.vmem [shape: f32[130,256], index: 1, kind: input, shape index: {}]   ;;  %s1817_s2 = inlined_call_operand.vmem [shape: f32[1,256], index: 2, kind: input, shape index: {}]   ;;  %s1818_s3 = inlined_call_operand.vmem [shape: f32[256,256], index: 3, kind: input, shape index: {}]   ;;  %s1819_s4 = inlined_call_operand.vmem [shape: f32[1,256], index: 4, kind: input, shape index: {}]   ;;  %s1820_s5 = inlined_call_operand.vmem [shape: f32[256,256], index: 5, kind: input, shape index: {}]   ;;  %s1821_s6 = inlined_call_operand.vmem [shape: f32[1,256], index: 6, kind: input, shape index: {}]   ;;  %s1822_s7 = inlined_call_operand.hbm [shape: f32[19,256], index: 7, kind: output, shape index: {}]  }
   0x1   :  { %14 = vsyncpa [#allocation3 + $0x1], 0  ;;  %s1169_s24 = smov 0   ;;  %s1171_s25 = smov 0  }
   0x2   :  { %s1173_s26 = smov 0   ;;  %s1175_s27 = smov 0  }
   0x3 LB: > { %s1190_s28 = sadd.s32 4294967295, %s1124_s27   ;;  %s926_s29 = sadd.s32 4294967294, %s1124_s27   ;;  %s1124_s27 = sphi %s1175_s27, %s1831_s27   ;;  %s1120_s26 = sphi %s1173_s26, %s1830_s26   ;;  %s1116_s25 = sphi %s1171_s25, %s1829_s25   ;;  %s1112_s24 = sphi %s1169_s24, %s1828_s24  }
   0x4   : > { %s1194_s30 = sadd.s32 1, %s1124_s27   ;;  %s179_s8 = sadd.s32 1, %s1120_s26 }
   0x5   : > { %s176_s9 = ssub.s32 %s1124_s27, %s1194_s30  ;;  %p189_p0 = scmp.ne.s32.totalorder %s1120_s26, %s1116_s25 }
   0x6   : > { %p177_p1 = scmp.eq.s32.totalorder %s176_s9, 0  ;;  %p190_p2 = scmp.eq.s32.totalorder %s1190_s28, 1 }
   0x7   : > { %p195_p3 = scmp.ne.s32.totalorder %s1116_s25, %s1112_s24  ;;  %p196_p4 = scmp.eq.s32.totalorder %s926_s29, 1 }
   0x8   : > { %s1205_s10 = scalar_select %p177_p1, %s1120_s26, %s179_s8  }
   0x9   : > { %p1207_p5 = por %p190_p2, %p189_p0  ;;  %p1211_p6 = por %p196_p4, %p195_p3 }
   0xa   : > { %p929_p7 = scmp.ge.s32.totalorder %s1124_s27, 1  ;;  %p252_p8 = scmp.lt.s32.totalorder %s1124_s27, 3 }
   0xc   : > { %p253_p9 = pnand %p929_p7, %p252_p8 }
   0xd   : > { %s1227_s19 = sshll.u32 (!%p253_p9), %s1190_s28, 1 }
   0xe   : > { %256 = sbr.rel (%p253_p9) target bundleno = 544 (0x220), region = 48  ;;  %p296_p10 = scmp.lt.s32.totalorder (!%p253_p9), %s1227_s19, 2 }
  0x13   : > { %v348_v0 = vld [vmem:[%s1816_s1 + $0xf8] sm:$0xff]  ;;  %v347_v1 = vld [vmem:[%s1816_s1 + $0xf0] sm:$0xff]  ;;  %v346_v2 = vld [vmem:[%s1816_s1 + $0xe8] sm:$0xff]  ;;  %s297_s9 = scalar_select %p296_p10, %s1227_s19, 2  ;;  %vm364_vm0 = vcmask 1041408   ;;  %vm357_vm1 = vcmask 15360  }
  0x14   : > { %417 = vmatpush.msra.mxu2 %v348_v0  ;;  %371 = vmatpush.msra.mxu0 %v347_v1  ;;  %v345_v3 = vld [vmem:[%s1816_s1 + $0xe0] sm:$0xff]  ;;  %v344_v4 = vld [vmem:[%s1816_s1 + $0xd8] sm:$0xff]  ;;  %v343_v5 = vld [vmem:[%s1816_s1 + $0xd0] sm:$0xff]  ;;  %s848_s21 = ssub.s32 (%p1207_p5), 3, %s1227_s19 }
  0x15   : > { %v342_v6 = vld [vmem:[%s1816_s1 + $0xc8] sm:$0xff]  ;;  %v341_v7 = vld [vmem:[%s1816_s1 + $0xc0] sm:$0xff]  ;;  %v340_v8 = vld [vmem:[%s1816_s1 + $0xb8] sm:$0xff]  ;;  %s951_s22 = sshll.u32 %s297_s9, 4  ;;  %p849_p11 = scmp.lt.s32.totalorder (%p1207_p5), %s848_s21, 2 }
  0x16   : > { %418 = vmatpush.msra.mxu2 %v346_v2  ;;  %372 = vmatpush.msra.mxu0 %v345_v3  ;;  %v339_v9 = vld [vmem:[%s1816_s1 + $0xb0] sm:$0xff]  ;;  %v338_v10 = vld [vmem:[%s1816_s1 + $0xa8] sm:$0xff]  ;;  %v337_v11 = vld [vmem:[%s1816_s1 + $0xa0] sm:$0xff]  ;;  %s1267_s20 = scalar_lea.vmem %s1815_s0, %s951_s22  ;;  %s287_s22 = sand.u32 1, %s1116_s25  }
  0x17   : > { %v336_v12 = vld [vmem:[%s1816_s1 + $0x98] sm:$0xff]  ;;  %v335_v13 = vld [vmem:[%s1816_s1 + $0x90] sm:$0xff]  ;;  %v350_v14 = vld [vmem:[%s1816_s1 + $0x108] sm:$0x3]  ;;  %s930_s9 = sshll.u32 %s287_s22, 5 }
  0x18   : > { %419 = vmatpush.msra.mxu2 %v344_v4  ;;  %373 = vmatpush.msra.mxu0 %v343_v5  ;;  %v349_v15 = vld [vmem:[%s1816_s1 + $0x100] sm:$0x3]  ;;  %v314_v16 = vld [vmem:[%s1267_s20 + $0x8] sm:$0xff]  ;;  %v509_v19 = vld [vmem:[%s1818_s3 + $0xf0] sm:$0xff]  ;;  %s289_s18 = scalar_lea.vmem [#allocation2], %s930_s9 }
  0x19   : > { %v334_v17 = vld [vmem:[%s1816_s1 + $0x88] sm:$0xff]  ;;  %v333_v18 = vld [vmem:[%s1816_s1 + $0x80] sm:$0xff]  ;;  %937 = vmatpush.msk.msra.mxu3 %vm364_vm0, %v350_v14  ;;  %934 = vmatpush.msk.msra.mxu1 %vm364_vm0, %v349_v15  ;;  %v332_v20 = vld [vmem:[%s1816_s1 + $0x78] sm:$0xff] }
  0x1a   : > { %420 = vmatpush.msra.mxu2 %v342_v6  ;;  %374 = vmatpush.msra.mxu0 %v341_v7  ;;  %v331_v21 = vld [vmem:[%s1816_s1 + $0x70] sm:$0xff]  ;;  %v507_v23 = vld [vmem:[%s1818_s3 + $0xe0] sm:$0xff]  ;;  %v330_v24 = vld [vmem:[%s1816_s1 + $0x68] sm:$0xff] }
  0x1b   : > { %938 = vmatmul.msk.f32.vlgmr.msra.gmra.mxu3 %vm357_vm1, %v314_v16  ;;  %935 = vmatmul.msk.f32.vlgmr.msra.gmra.mxu1 %vm357_vm1, %v314_v16  ;;  %v541_v22 = vld [vmem:[%s1818_s3 + $0x1f0] sm:$0xff]  ;;  %v329_v25 = vld [vmem:[%s1816_s1 + $0x60] sm:$0xff]  ;;  %v328_v29 = vld [vmem:[%s1816_s1 + $0x58] sm:$0xff] }
  0x1c   : > { %421 = vmatpush.msra.mxu2 %v340_v8  ;;  %375 = vmatpush.msra.mxu0 %v339_v9  ;;  %v539_v26 = vld [vmem:[%s1818_s3 + $0x1e0] sm:$0xff]  ;;  %v505_v27 = vld [vmem:[%s1818_s3 + $0xd0] sm:$0xff]  ;;  %v316_v31 = vld [vmem:[%s1267_s20 + $0x18] sm:$0xff] }
  0x1d   : > { %549 = vmatpush.msrb.mxu1 %v509_v19  ;;  %572 = vmatpush.msrb.mxu3 %v541_v22  ;;  %v537_v28 = vld [vmem:[%s1818_s3 + $0x1d0] sm:$0xff]  ;;  %v326_v32 = vld [vmem:[%s1816_s1 + $0x48] sm:$0xff]  ;;  %v325_v33 = vld [vmem:[%s1816_s1 + $0x40] sm:$0xff] }
  0x1e   : > { %422 = vmatpush.msra.mxu2 %v338_v10  ;;  %376 = vmatpush.msra.mxu0 %v337_v11  ;;  %v327_v30 = vld [vmem:[%s1816_s1 + $0x50] sm:$0xff]  ;;  %v503_v34 = vld [vmem:[%s1818_s3 + $0xc0] sm:$0xff]  ;;  %v324_v36 = vld [vmem:[%s1816_s1 + $0x38] sm:$0xff] }
  0x1f   : > { %550 = vmatpush.msrb.mxu1 %v507_v23  ;;  %573 = vmatpush.msrb.mxu3 %v539_v26  ;;  %v535_v35 = vld [vmem:[%s1818_s3 + $0x1c0] sm:$0xff]  ;;  %v323_v37 = vld [vmem:[%s1816_s1 + $0x30] sm:$0xff]  ;;  %v322_v39 = vld [vmem:[%s1816_s1 + $0x28] sm:$0xff] }
  0x20   : > { %423 = vmatpush.msra.mxu2 %v336_v12  ;;  %377 = vmatpush.msra.mxu0 %v335_v13  ;;  %v501_v38 = vld [vmem:[%s1818_s3 + $0xb0] sm:$0xff]  ;;  %v321_v40 = vld [vmem:[%s1816_s1 + $0x20] sm:$0xff]  ;;  %v320_v42 = vld [vmem:[%s1816_s1 + $0x18] sm:$0xff] }
  0x21   : > { %551 = vmatpush.msrb.mxu1 %v505_v27  ;;  %574 = vmatpush.msrb.mxu3 %v537_v28  ;;  %v499_v41 = vld [vmem:[%s1818_s3 + $0xa0] sm:$0xff]  ;;  %v319_v43 = vld [vmem:[%s1816_s1 + $0x10] sm:$0xff]  ;;  %v318_v45 = vld [vmem:[%s1816_s1 + $0x8] sm:$0xff] }
  0x22   : > { %424 = vmatpush.msra.mxu2 %v334_v17  ;;  %378 = vmatpush.msra.mxu0 %v333_v18  ;;  %v497_v44 = vld [vmem:[%s1818_s3 + $0x90] sm:$0xff]  ;;  %v317_v46 = vld [vmem:[%s1816_s1] sm:$0xff]  ;;  %v510_v48 = vld [vmem:[%s1818_s3 + $0xf8] sm:$0xff] }
  0x23   : > { %939 = vmatmul.msk.f32.gmra.mxu3 %vm357_vm1, %v316_v31  ;;  %936 = vmatmul.msk.f32.gmra.mxu1 %vm357_vm1, %v316_v31  ;;  %v313_v47 = vld [vmem:[%s1267_s20] sm:$0xff]  ;;  %v542_v49 = vld [vmem:[%s1818_s3 + $0x1f8] sm:$0xff]  ;;  %v508_v50 = vld [vmem:[%s1818_s3 + $0xe8] sm:$0xff] }
  0x24   : > { %425 = vmatpush.msra.mxu2 %v332_v20  ;;  %379 = vmatpush.msra.mxu0 %v331_v21  ;;  %v540_v51 = vld [vmem:[%s1818_s3 + $0x1e8] sm:$0xff]  ;;  %v506_v52 = vld [vmem:[%s1818_s3 + $0xd8] sm:$0xff]  ;;  %v315_v56 = vld [vmem:[%s1267_s20 + $0x10] sm:$0xff]  ;;  %s1755_s20 = scalar_lea.sflag [#allocation3], %s287_s22 }
  0x25   : > { %552 = vmatpush.msrb.mxu1 %v503_v34  ;;  %575 = vmatpush.msrb.mxu3 %v535_v35  ;;  %v538_v53 = vld [vmem:[%s1818_s3 + $0x1d8] sm:$0xff]  ;;  %v504_v54 = vld [vmem:[%s1818_s3 + $0xc8] sm:$0xff]  ;;  %v533_v60 = vld [vmem:[%s1818_s3 + $0x1b0] sm:$0xff] }
  0x26   : > { %426 = vmatpush.msra.mxu2 %v330_v24  ;;  %380 = vmatpush.msra.mxu0 %v329_v25  ;;  %v536_v55 = vld [vmem:[%s1818_s3 + $0x1c8] sm:$0xff]  ;;  %v502_v57 = vld [vmem:[%s1818_s3 + $0xb8] sm:$0xff]  ;;  %v495_v62 = vld [vmem:[%s1818_s3 + $0x80] sm:$0xff] }
  0x27   : > { %553 = vmatpush.msrb.mxu1 %v501_v38  ;;  %v500_v58 = vld [vmem:[%s1818_s3 + $0xa8] sm:$0xff]  ;;  %v498_v59 = vld [vmem:[%s1818_s3 + $0x98] sm:$0xff]  ;;  %576 = vmatpush.msrb.mxu3 %v533_v60  ;;  %v531_v0 = vld [vmem:[%s1818_s3 + $0x1a0] sm:$0xff] }
  0x28   : > { %427 = vmatpush.msra.mxu2 %v328_v29  ;;  %381 = vmatpush.msra.mxu0 %v327_v30  ;;  %v534_v61 = vld [vmem:[%s1818_s3 + $0x1b8] sm:$0xff]  ;;  %v496_v63 = vld [vmem:[%s1818_s3 + $0x88] sm:$0xff]  ;;  %v493_v2 = vld [vmem:[%s1818_s3 + $0x70] sm:$0xff] }
  0x29   : > { %554 = vmatpush.msrb.mxu1 %v499_v41  ;;  %v532_v1 = vld [vmem:[%s1818_s3 + $0x1a8] sm:$0xff]  ;;  %577 = vmatpush.msrb.mxu3 %v531_v0  ;;  %v494_v3 = vld [vmem:[%s1818_s3 + $0x78] sm:$0xff]  ;;  %v529_v4 = vld [vmem:[%s1818_s3 + $0x190] sm:$0xff] }
  0x2a   : > { %428 = vmatpush.msra.mxu2 %v326_v32  ;;  %382 = vmatpush.msra.mxu0 %v325_v33  ;;  %v530_v5 = vld [vmem:[%s1818_s3 + $0x198] sm:$0xff]  ;;  %v491_v6 = vld [vmem:[%s1818_s3 + $0x60] sm:$0xff]  ;;  %v492_v7 = vld [vmem:[%s1818_s3 + $0x68] sm:$0xff] }
  0x2b   : > { %555 = vmatpush.msrb.mxu1 %v497_v44  ;;  %578 = vmatpush.msrb.mxu3 %v529_v4  ;;  %v527_v8 = vld [vmem:[%s1818_s3 + $0x180] sm:$0xff]  ;;  %v528_v9 = vld [vmem:[%s1818_s3 + $0x188] sm:$0xff]  ;;  %v489_v10 = vld [vmem:[%s1818_s3 + $0x50] sm:$0xff] }
  0x2c   : > { %429 = vmatpush.msra.mxu2 %v324_v36  ;;  %383 = vmatpush.msra.mxu0 %v323_v37  ;;  %v490_v11 = vld [vmem:[%s1818_s3 + $0x58] sm:$0xff]  ;;  %v525_v12 = vld [vmem:[%s1818_s3 + $0x170] sm:$0xff]  ;;  %v487_v14 = vld [vmem:[%s1818_s3 + $0x40] sm:$0xff] }
  0x2d   : > { %556 = vmatpush.msrb.mxu1 %v495_v62  ;;  %579 = vmatpush.msrb.mxu3 %v527_v8  ;;  %v526_v13 = vld [vmem:[%s1818_s3 + $0x178] sm:$0xff]  ;;  %v488_v15 = vld [vmem:[%s1818_s3 + $0x48] sm:$0xff]  ;;  %v523_v16 = vld [vmem:[%s1818_s3 + $0x160] sm:$0xff] }
  0x2e   : > { %430 = vmatpush.msra.mxu2 %v322_v39  ;;  %384 = vmatpush.msra.mxu0 %v321_v40  ;;  %v524_v17 = vld [vmem:[%s1818_s3 + $0x168] sm:$0xff]  ;;  %v485_v18 = vld [vmem:[%s1818_s3 + $0x30] sm:$0xff]  ;;  %v486_v19 = vld [vmem:[%s1818_s3 + $0x38] sm:$0xff] }
  0x2f   : > { %557 = vmatpush.msrb.mxu1 %v493_v2  ;;  %580 = vmatpush.msrb.mxu3 %v525_v12  ;;  %v521_v20 = vld [vmem:[%s1818_s3 + $0x150] sm:$0xff]  ;;  %v522_v21 = vld [vmem:[%s1818_s3 + $0x158] sm:$0xff]  ;;  %v483_v22 = vld [vmem:[%s1818_s3 + $0x20] sm:$0xff] }
  0x30   : > { %431 = vmatpush.msra.mxu2 %v320_v42  ;;  %385 = vmatpush.msra.mxu0 %v319_v43  ;;  %v484_v23 = vld [vmem:[%s1818_s3 + $0x28] sm:$0xff]  ;;  %v519_v24 = vld [vmem:[%s1818_s3 + $0x140] sm:$0xff]  ;;  %v481_v26 = vld [vmem:[%s1818_s3 + $0x10] sm:$0xff] }
  0x31   : > { %558 = vmatpush.msrb.mxu1 %v491_v6  ;;  %581 = vmatpush.msrb.mxu3 %v523_v16  ;;  %v520_v25 = vld [vmem:[%s1818_s3 + $0x148] sm:$0xff]  ;;  %v482_v27 = vld [vmem:[%s1818_s3 + $0x18] sm:$0xff]  ;;  %v517_v28 = vld [vmem:[%s1818_s3 + $0x130] sm:$0xff] }
  0x32   : > { %432 = vmatpush.msra.mxu2 %v318_v45  ;;  %386 = vmatpush.msra.mxu0 %v317_v46  ;;  %v518_v29 = vld [vmem:[%s1818_s3 + $0x138] sm:$0xff]  ;;  %v479_v30 = vld [vmem:[%s1818_s3] sm:$0xff]  ;;  %v480_v31 = vld [vmem:[%s1818_s3 + $0x8] sm:$0xff] }
  0x33   : > { %433 = vmatmul.f32.vlgmr.msra.gmra.mxu2 %v313_v47  ;;  %387 = vmatmul.f32.vlgmr.msra.gmra.mxu0 %v313_v47  ;;  %v515_v32 = vld [vmem:[%s1818_s3 + $0x120] sm:$0xff]  ;;  %v516_v33 = vld [vmem:[%s1818_s3 + $0x128] sm:$0xff]  ;;  %v513_v34 = vld [vmem:[%s1818_s3 + $0x110] sm:$0xff] }
  0x34   : > { %595 = vmatpush.msrb.mxu0 %v510_v48  ;;  %618 = vmatpush.msrb.mxu2 %v542_v49  ;;  %v514_v35 = vld [vmem:[%s1818_s3 + $0x118] sm:$0xff]  ;;  %v511_v36 = vld [vmem:[%s1818_s3 + $0x100] sm:$0xff]  ;;  %v512_v37 = vld [vmem:[%s1818_s3 + $0x108] sm:$0xff] }
  0x35   : > { %559 = vmatpush.msrb.mxu1 %v489_v10  ;;  %582 = vmatpush.msrb.mxu3 %v521_v20  ;;  %v1532_v38 = vld [vmem:[%s1817_s2] sm:$0x3]  ;;  %v687_v42 = vld [vmem:[%s1820_s5 + $0xf0] sm:$0xff]  ;;  %v1581_v60 = vld [vmem:[%s1820_s5 + $0xe8] sm:$0xff] }
  0x36   : > { %596 = vmatpush.msrb.mxu0 %v508_v50  ;;  %619 = vmatpush.msrb.mxu2 %v540_v51  ;;  %v353_v39 = vperm.slane %v1532_v38, 0  ;;  %v719_v43 = vld [vmem:[%s1820_s5 + $0x1f0] sm:$0xff]  ;;  %v685_v44 = vld [vmem:[%s1820_s5 + $0xe0] sm:$0xff]  ;;  %v354_v50 = vperm.slane %v1532_v38, 1  ;;  %v1586_v62 = vld [vmem:[%s1820_s5 + $0x1e8] sm:$0xff] }
  0x37   : > { %560 = vmatpush.msrb.mxu1 %v487_v14  ;;  %583 = vmatpush.msrb.mxu3 %v519_v24  ;;  %v717_v46 = vld [vmem:[%s1820_s5 + $0x1e0] sm:$0xff]  ;;  %v683_v47 = vld [vmem:[%s1820_s5 + $0xd0] sm:$0xff]  ;;  %v714_v38 = vld [vmem:[%s1820_s5 + $0x1c8] sm:$0xff] }
  0x38   : > { %597 = vmatpush.msrb.mxu0 %v506_v52  ;;  %620 = vmatpush.msrb.mxu2 %v538_v53  ;;  %v715_v48 = vld [vmem:[%s1820_s5 + $0x1d0] sm:$0xff]  ;;  %v681_v52 = vld [vmem:[%s1820_s5 + $0xc0] sm:$0xff] }
  0x39   : > { %561 = vmatpush.msrb.mxu1 %v485_v18  ;;  %584 = vmatpush.msrb.mxu3 %v517_v28  ;;  %v713_v53 = vld [vmem:[%s1820_s5 + $0x1c0] sm:$0xff]  ;;  %v707_v6 = vld [vmem:[%s1820_s5 + $0x190] sm:$0xff] }
  0x3a   : > { %598 = vmatpush.msrb.mxu0 %v504_v54  ;;  %621 = vmatpush.msrb.mxu2 %v536_v55  ;;  %v1563_v55 = vld [vmem:[%s1820_s5 + $0xf8] sm:$0xff]  ;;  %v709_v2 = vld [vmem:[%s1820_s5 + $0x1a0] sm:$0xff]  ;;  %v671_v16 = vld [vmem:[%s1820_s5 + $0x70] sm:$0xff] }
  0x3b   : > { %436 = vmatmul.f32.gmra.mxu2 %v315_v56  ;;  %390 = vmatmul.f32.gmra.mxu0 %v315_v56  ;;  %v1568_v56 = vld [vmem:[%s1820_s5 + $0x1f8] sm:$0xff]  ;;  %v705_v10 = vld [vmem:[%s1820_s5 + $0x180] sm:$0xff] }
  0x3c   : > { %599 = vmatpush.msrb.mxu0 %v502_v57  ;;  %622 = vmatpush.msrb.mxu2 %v534_v61  ;;  %v669_v20 = vld [vmem:[%s1820_s5 + $0x60] sm:$0xff] }
  0x3d   : > { %562 = vmatpush.msrb.mxu1 %v483_v22  ;;  %585 = vmatpush.msrb.mxu3 %v515_v32 }
  0x3e   : > { %600 = vmatpush.msrb.mxu0 %v500_v58  ;;  %623 = vmatpush.msrb.mxu2 %v532_v1  ;;  %v679_v58 = vld [vmem:[%s1820_s5 + $0xb0] sm:$0xff]  ;;  %v677_v1 = vld [vmem:[%s1820_s5 + $0xa0] sm:$0xff] }
  0x3f   : > { %563 = vmatpush.msrb.mxu1 %v481_v26  ;;  %586 = vmatpush.msrb.mxu3 %v513_v34  ;;  %v716_v34 = vld [vmem:[%s1820_s5 + $0x1d8] sm:$0xff] }
  0x40   : > { %601 = vmatpush.msrb.mxu0 %v498_v59  ;;  %624 = vmatpush.msrb.mxu2 %v530_v5  ;;  %v711_v59 = vld [vmem:[%s1820_s5 + $0x1b0] sm:$0xff] }
  0x41   : > { %564 = vmatpush.msrb.mxu1 %v479_v30  ;;  %587 = vmatpush.msrb.mxu3 %v511_v36  ;;  %v675_v5 = vld [vmem:[%s1820_s5 + $0x90] sm:$0xff] }
  0x42   : > { %602 = vmatpush.msrb.mxu0 %v496_v63  ;;  %625 = vmatpush.msrb.mxu2 %v528_v9  ;;  %v673_v9 = vld [vmem:[%s1820_s5 + $0x80] sm:$0xff]  ;;  %v699_v36 = vld [vmem:[%s1820_s5 + $0x150] sm:$0xff] }
  0x43   : > { %727 = vmatpush.msra.mxu1 %v687_v42  ;;  %750 = vmatpush.msra.mxu3 %v719_v43  ;;  %v712_v42 = vld [vmem:[%s1820_s5 + $0x1b8] sm:$0xff]  ;;  %v663_v43 = vld [vmem:[%s1820_s5 + $0x30] sm:$0xff] }
  0x44   : > { %603 = vmatpush.msrb.mxu0 %v494_v3  ;;  %626 = vmatpush.msrb.mxu2 %v526_v13 }
  0x45   : > { %728 = vmatpush.msra.mxu1 %v685_v44  ;;  %751 = vmatpush.msra.mxu3 %v717_v46  ;;  %v695_v44 = vld [vmem:[%s1820_s5 + $0x130] sm:$0xff]  ;;  %v710_v46 = vld [vmem:[%s1820_s5 + $0x1a8] sm:$0xff] }
  0x46   : > { %604 = vmatpush.msrb.mxu0 %v492_v7  ;;  %627 = vmatpush.msrb.mxu2 %v524_v17  ;;  %v703_v17 = vld [vmem:[%s1820_s5 + $0x170] sm:$0xff] }
  0x47   : > { %729 = vmatpush.msra.mxu1 %v683_v47  ;;  %752 = vmatpush.msra.mxu3 %v715_v48  ;;  %v661_v47 = vld [vmem:[%s1820_s5 + $0x20] sm:$0xff] }
  0x48   : > { %605 = vmatpush.msrb.mxu0 %v490_v11  ;;  %628 = vmatpush.msrb.mxu2 %v522_v21  ;;  %v701_v21 = vld [vmem:[%s1820_s5 + $0x160] sm:$0xff] }
  0x49   : > { %730 = vmatpush.msra.mxu1 %v681_v52  ;;  %753 = vmatpush.msra.mxu3 %v713_v53  ;;  %v693_v48 = vld [vmem:[%s1820_s5 + $0x120] sm:$0xff]  ;;  %v691_v52 = vld [vmem:[%s1820_s5 + $0x110] sm:$0xff]  ;;  %v674_v53 = vld [vmem:[%s1820_s5 + $0x88] sm:$0xff] }
  0x4a   : > { %606 = vmatpush.msrb.mxu0 %v488_v15  ;;  %629 = vmatpush.msrb.mxu2 %v520_v25 }
  0x4b   : > { %731 = vmatpush.msra.mxu1 %v679_v58  ;;  %754 = vmatpush.msra.mxu3 %v711_v59  ;;  %v689_v58 = vld [vmem:[%s1820_s5 + $0x100] sm:$0xff]  ;;  %v672_v59 = vld [vmem:[%s1820_s5 + $0x78] sm:$0xff] }
  0x4c   : > { %607 = vmatpush.msrb.mxu0 %v486_v19  ;;  %630 = vmatpush.msrb.mxu2 %v518_v29 }
  0x4d   : > { %732 = vmatpush.msra.mxu1 %v677_v1  ;;  %755 = vmatpush.msra.mxu3 %v709_v2  ;;  %v664_v1 = vld [vmem:[%s1820_s5 + $0x38] sm:$0xff] }
  0x4e   : > { %608 = vmatpush.msrb.mxu0 %v484_v23  ;;  %631 = vmatpush.msrb.mxu2 %v516_v33  ;;  %v684_v33 = vld [vmem:[%s1820_s5 + $0xd8] sm:$0xff] }
  0x4f   : > { %733 = vmatpush.msra.mxu1 %v675_v5  ;;  %756 = vmatpush.msra.mxu3 %v707_v6  ;;  %v696_v2 = vld [vmem:[%s1820_s5 + $0x138] sm:$0xff] }
  0x50   : > { %609 = vmatpush.msrb.mxu0 %v482_v27  ;;  %632 = vmatpush.msrb.mxu2 %v514_v35  ;;  %v667_v35 = vld [vmem:[%s1820_s5 + $0x50] sm:$0xff]  ;;  %v660_v5 = vld [vmem:[%s1820_s5 + $0x18] sm:$0xff] }
  0x51   : > { %734 = vmatpush.msra.mxu1 %v673_v9  ;;  %757 = vmatpush.msra.mxu3 %v705_v10  ;;  %v692_v6 = vld [vmem:[%s1820_s5 + $0x118] sm:$0xff]  ;;  %v543_v9 = vld [vmem:[%s1819_s4] sm:$0x3] }
  0x52   : > { %610 = vmatpush.msrb.mxu0 %v480_v31  ;;  %633 = vmatpush.msrb.mxu2 %v512_v37  ;;  %v682_v37 = vld [vmem:[%s1820_s5 + $0xc8] sm:$0xff] }
  0x53   : > { %735 = vmatpush.msra.mxu1 %v671_v16  ;;  %758 = vmatpush.msra.mxu3 %v703_v17 }
  0x54   : > { %773 = vmatpush.msra.mxu0 %v1563_v55  ;;  %796 = vmatpush.msra.mxu2 %v1568_v56 }
  0x55   : > { %736 = vmatpush.msra.mxu1 %v669_v20  ;;  %759 = vmatpush.msra.mxu3 %v701_v21 }
  0x56   : > { %774 = vmatpush.msra.mxu0 %v1581_v60  ;;  %797 = vmatpush.msra.mxu2 %v1586_v62 }
  0x57   : > { %737 = vmatpush.msra.mxu1 %v667_v35  ;;  %760 = vmatpush.msra.mxu3 %v699_v36 }
  0x58   : > { %775 = vmatpush.msra.mxu0 %v684_v33  ;;  %798 = vmatpush.msra.mxu2 %v716_v34 }
  0x5a   : > { %776 = vmatpush.msra.mxu0 %v682_v37  ;;  %799 = vmatpush.msra.mxu2 %v714_v38 }
  0x5c   : > { %800 = vmatpush.msra.mxu2 %v712_v42 }
  0x5e   : > { %801 = vmatpush.msra.mxu2 %v710_v46 }
  0x98   : > { %v411_v40 = vpop.f32.mrf.mxu1 }
  0x9e   : > { %v457_v51 = vpop.f32.mrf.mxu3 }
  0xa0   : > { %v414_v0 = vpop.f32.mrf.mxu1 }
  0xa6   : > { %v460_v15 = vpop.f32.mrf.mxu3 }
  0xb0   : > { %v388_v41 = vpop.f32.mrf.mxu0 }
  0xb1   : > { %v389_v45 = vadd.f32 %v388_v41, %v353_v39  ;;  %v680_v41 = vld [vmem:[%s1820_s5 + $0xb8] sm:$0xff] }
  0xb2   : > { %777 = vmatpush.msra.mxu0 %v680_v41 }
  0xb3   : > { %v412_v49 = vadd.f32 %v411_v40, %v389_v45  ;;  %v697_v40 = vld [vmem:[%s1820_s5 + $0x140] sm:$0xff]  ;;  %v678_v45 = vld [vmem:[%s1820_s5 + $0xa8] sm:$0xff] }
  0xb4   : > { %761 = vmatpush.msra.mxu3 %v697_v40  ;;  %778 = vmatpush.msra.mxu0 %v678_v45 }
  0xb5   : > { %v463_v54 = vmul.f32 0.5, %v412_v49  ;;  %v676_v49 = vld [vmem:[%s1820_s5 + $0x98] sm:$0xff] }
  0xb6   : > { %v434_v57 = vpop.f32.mrf.mxu2  ;;  %762 = vmatpush.msra.mxu3 %v695_v44  ;;  %779 = vmatpush.msra.mxu0 %v676_v49  ;;  %v721_v44 = vld [vmem:[%s1821_s6] sm:$0x3] }
  0xb7   : > { %1027 = vtanh.f32 %v463_v54  ;;  %v435_v61 = vadd.f32 %v434_v57, %v354_v50  ;;  %v657_v57 = vld [vmem:[%s1820_s5] sm:$0xff] }
  0xb8   : > { %v391_v63 = vpop.f32.mrf.mxu0  ;;  %763 = vmatpush.msra.mxu3 %v693_v48  ;;  %780 = vmatpush.msra.mxu0 %v674_v53 }
  0xb9   : > { %v458_v3 = vadd.f32 %v457_v51, %v435_v61  ;;  %v392_v4 = vadd.f32 %v391_v63, %v353_v39  ;;  %v665_v39 = vld [vmem:[%s1820_s5 + $0x40] sm:$0xff]  ;;  %v659_v51 = vld [vmem:[%s1820_s5 + $0x10] sm:$0xff]  ;;  %v704_v61 = vld [vmem:[%s1820_s5 + $0x178] sm:$0xff] }
  0xba   : > { %738 = vmatpush.msra.mxu1 %v665_v39  ;;  %764 = vmatpush.msra.mxu3 %v691_v52  ;;  %v670_v63 = vld [vmem:[%s1820_s5 + $0x68] sm:$0xff] }
  0xbb   : > { %v464_v7 = vmul.f32 0.5, %v458_v3  ;;  %v415_v8 = vadd.f32 %v414_v0, %v392_v4  ;;  %781 = vmatpush.msra.mxu0 %v672_v59  ;;  %v702_v0 = vld [vmem:[%s1820_s5 + $0x168] sm:$0xff] }
  0xbc   : > { %739 = vmatpush.msra.mxu1 %v663_v43  ;;  %765 = vmatpush.msra.mxu3 %v689_v58  ;;  %v662_v3 = vld [vmem:[%s1820_s5 + $0x28] sm:$0xff] }
  0xbd   : > { %v1028_v11 = vpop.eup %1027  ;;  %1029 = vtanh.f32 %v464_v7  ;;  %v465_v12 = vmul.f32 0.5, %v415_v8  ;;  %782 = vmatpush.msra.mxu0 %v670_v63  ;;  %v694_v4 = vld [vmem:[%s1820_s5 + $0x128] sm:$0xff] }
  0xbe   : > { %v471_v13 = vadd.f32 1.0, %v1028_v11  ;;  %v437_v14 = vpop.f32.mrf.mxu2  ;;  %740 = vmatpush.msra.mxu1 %v661_v47  ;;  %v690_v8 = vld [vmem:[%s1820_s5 + $0x108] sm:$0xff]  ;;  %v724_v47 = vperm.slane %v721_v44, 1 }
  0xbf   : > { %1031 = vtanh.f32 %v465_v12  ;;  %v438_v18 = vadd.f32 %v437_v14, %v354_v50  ;;  %v708_v50 = vld [vmem:[%s1820_s5 + $0x198] sm:$0xff] }
  0xc0   : > { %v475_v19 = vmul.f32 %v471_v13, %v463_v54  ;;  %802 = vmatpush.msra.mxu2 %v708_v50  ;;  %741 = vmatpush.msra.mxu1 %v659_v51  ;;  %v706_v54 = vld [vmem:[%s1820_s5 + $0x188] sm:$0xff]  ;;  %v546_v13 = vperm.slane %v543_v9, 1 }
  0xc1   : > { %v461_v22 = vadd.f32 %v460_v15, %v438_v18 }
  0xc2   : > { %565 = vmatmul.f32.vlgmr.msrb.gmra.mxu1 %v475_v19  ;;  %611 = vmatmul.f32.vlgmr.msrb.gmra.mxu0 %v475_v19 }
  0xc3   : > { %v1030_v23 = vpop.eup %1029  ;;  %v466_v24 = vmul.f32 0.5, %v461_v22  ;;  %803 = vmatpush.msra.mxu2 %v706_v54  ;;  %742 = vmatpush.msra.mxu1 %v657_v57 }
  0xc4   : > { %v472_v25 = vadd.f32 1.0, %v1030_v23 }
  0xc5   : > { %v1032_v26 = vpop.eup %1031  ;;  %1033 = vtanh.f32 %v466_v24  ;;  %955 = vmatpush.msrb.mxu1 %v1563_v55  ;;  %804 = vmatpush.msra.mxu2 %v704_v61  ;;  %v668_v55 = vld [vmem:[%s1820_s5 + $0x58] sm:$0xff] }
  0xc6   : > { %v476_v27 = vmul.f32 %v472_v25, %v464_v7  ;;  %v473_v28 = vadd.f32 1.0, %v1032_v26  ;;  %783 = vmatpush.msra.mxu0 %v668_v55  ;;  %v658_v7 = vld [vmem:[%s1820_s5 + $0x8] sm:$0xff] }
  0xc7   : > { %956 = vmatpush.msrb.mxu1 %v1581_v60  ;;  %805 = vmatpush.msra.mxu2 %v702_v0  ;;  %v666_v60 = vld [vmem:[%s1820_s5 + $0x48] sm:$0xff] }
  0xc8   : > { %588 = vmatmul.f32.vlgmr.msrb.gmra.mxu3 %v476_v27  ;;  %634 = vmatmul.f32.vlgmr.msrb.gmra.mxu2 %v476_v27  ;;  %v477_v29 = vmul.f32 %v473_v28, %v465_v12  ;;  %v545_v12 = vperm.slane %v543_v9, 0 }
  0xc9   : > { %971 = vmatpush.msrb.mxu3 %v1568_v56  ;;  %v700_v56 = vld [vmem:[%s1820_s5 + $0x158] sm:$0xff]  ;;  %957 = vmatpush.msrb.mxu1 %v684_v33 }
  0xca   : > { %568 = vmatmul.f32.gmra.mxu1 %v477_v29  ;;  %614 = vmatmul.f32.gmra.mxu0 %v477_v29 }
  0xcb   : > { %v1034_v30 = vpop.eup %1033  ;;  %972 = vmatpush.msrb.mxu3 %v1586_v62  ;;  %806 = vmatpush.msra.mxu2 %v700_v56  ;;  %v698_v62 = vld [vmem:[%s1820_s5 + $0x148] sm:$0xff] }
  0xcc   : > { %v474_v31 = vadd.f32 1.0, %v1034_v30  ;;  %958 = vmatpush.msrb.mxu1 %v682_v37  ;;  %784 = vmatpush.msra.mxu0 %v666_v60 }
  0xcd   : > { %973 = vmatpush.msrb.mxu3 %v716_v34  ;;  %807 = vmatpush.msra.mxu2 %v698_v62 }
  0xce   : > { %v478_v32 = vmul.f32 %v474_v31, %v466_v24  ;;  %959 = vmatpush.msrb.mxu1 %v680_v41  ;;  %785 = vmatpush.msra.mxu0 %v664_v1 }
  0xcf   : > { %974 = vmatpush.msrb.mxu3 %v714_v38  ;;  %808 = vmatpush.msra.mxu2 %v696_v2 }
  0xd0   : > { %591 = vmatmul.f32.gmra.mxu3 %v478_v32  ;;  %637 = vmatmul.f32.gmra.mxu2 %v478_v32 }
  0xd1   : > { %975 = vmatpush.msrb.mxu3 %v712_v42  ;;  %960 = vmatpush.msrb.mxu1 %v678_v45 }
  0xd2   : > { %786 = vmatpush.msra.mxu0 %v662_v3  ;;  %809 = vmatpush.msra.mxu2 %v694_v4 }
  0xd3   : > { %976 = vmatpush.msrb.mxu3 %v710_v46  ;;  %961 = vmatpush.msrb.mxu1 %v676_v49  ;;  %v723_v46 = vperm.slane %v721_v44, 0 }
  0xd4   : > { %787 = vmatpush.msra.mxu0 %v660_v5  ;;  %810 = vmatpush.msra.mxu2 %v692_v6 }
  0xd5   : > { %977 = vmatpush.msrb.mxu3 %v708_v50  ;;  %962 = vmatpush.msrb.mxu1 %v674_v53 }
  0xd6   : > { %788 = vmatpush.msra.mxu0 %v658_v7  ;;  %811 = vmatpush.msra.mxu2 %v690_v8 }
  0xd7   : > { %978 = vmatpush.msrb.mxu3 %v706_v54  ;;  %963 = vmatpush.msrb.mxu1 %v672_v59 }
  0xd9   : > { %979 = vmatpush.msrb.mxu3 %v704_v61  ;;  %964 = vmatpush.msrb.mxu1 %v670_v63 }
  0xdb   : > { %980 = vmatpush.msrb.mxu3 %v702_v0  ;;  %965 = vmatpush.msrb.mxu1 %v668_v55 }
  0xdd   : > { %981 = vmatpush.msrb.mxu3 %v700_v56  ;;  %966 = vmatpush.msrb.mxu1 %v666_v60 }
  0xdf   : > { %982 = vmatpush.msrb.mxu3 %v698_v62  ;;  %967 = vmatpush.msrb.mxu1 %v664_v1 }
  0xe1   : > { %983 = vmatpush.msrb.mxu3 %v696_v2  ;;  %968 = vmatpush.msrb.mxu1 %v662_v3 }
  0xe3   : > { %984 = vmatpush.msrb.mxu3 %v694_v4  ;;  %969 = vmatpush.msrb.mxu1 %v660_v5 }
  0xe5   : > { %985 = vmatpush.msrb.mxu3 %v692_v6  ;;  %970 = vmatpush.msrb.mxu1 %v658_v7 }
  0xe7   : > { %986 = vmatpush.msrb.mxu3 %v690_v8 }
 0x13f   : > { %v566_v10 = vpop.f32.mrf.mxu1  ;;  %v612_v11 = vpop.f32.mrf.mxu0 }
 0x140   : > { %v567_v14 = vadd.f32 %v566_v10, %v545_v12  ;;  %v613_v15 = vadd.f32 %v612_v11, %v546_v13 }
 0x147   : > { %v569_v22 = vpop.f32.mrf.mxu1  ;;  %v615_v23 = vpop.f32.mrf.mxu0 }
 0x148   : > { %v570_v24 = vadd.f32 %v569_v22, %v545_v12  ;;  %v616_v25 = vadd.f32 %v615_v23, %v546_v13 }
 0x14b   : > { %v589_v16 = vpop.f32.mrf.mxu3  ;;  %v635_v17 = vpop.f32.mrf.mxu2 }
 0x14c   : > { %v590_v18 = vadd.f32 %v589_v16, %v567_v14  ;;  %v636_v19 = vadd.f32 %v635_v17, %v613_v15 }
 0x14e   : > { %v641_v20 = vmul.f32 0.5, %v590_v18  ;;  %v642_v21 = vmul.f32 0.5, %v636_v19 }
 0x150   : > { %1035 = vtanh.f32 %v641_v20 }
 0x151   : > { %1037 = vtanh.f32 %v642_v21 }
 0x153   : > { %v592_v26 = vpop.f32.mrf.mxu3  ;;  %v638_v27 = vpop.f32.mrf.mxu2 }
 0x154   : > { %v593_v28 = vadd.f32 %v592_v26, %v570_v24  ;;  %v639_v29 = vadd.f32 %v638_v27, %v616_v25 }
 0x156   : > { %v1036_v30 = vpop.eup %1035  ;;  %v643_v31 = vmul.f32 0.5, %v593_v28  ;;  %v644_v32 = vmul.f32 0.5, %v639_v29 }
 0x157   : > { %v1038_v33 = vpop.eup %1037  ;;  %v649_v34 = vadd.f32 1.0, %v1036_v30 }
 0x158   : > { %v650_v35 = vadd.f32 1.0, %v1038_v33  ;;  %1039 = vtanh.f32 %v643_v31 }
 0x159   : > { %v653_v36 = vmul.f32 %v649_v34, %v641_v20  ;;  %1041 = vtanh.f32 %v644_v32 }
 0x15a   : > { %v654_v37 = vmul.f32 %v650_v35, %v642_v21 }
 0x15b   : > { %743 = vmatmul.f32.vlgmr.msra.gmra.mxu1 %v653_v36  ;;  %789 = vmatmul.f32.vlgmr.msra.gmra.mxu0 %v653_v36 }
 0x15c   : > { %766 = vmatmul.f32.vlgmr.msra.gmra.mxu3 %v654_v37  ;;  %812 = vmatmul.f32.vlgmr.msra.gmra.mxu2 %v654_v37 }
 0x15e   : > { %v1040_v38 = vpop.eup %1039 }
 0x15f   : > { %v1042_v39 = vpop.eup %1041  ;;  %v651_v40 = vadd.f32 1.0, %v1040_v38 }
 0x160   : > { %v652_v41 = vadd.f32 1.0, %v1042_v39 }
 0x161   : > { %v655_v42 = vmul.f32 %v651_v40, %v643_v31 }
 0x162   : > { %v656_v43 = vmul.f32 %v652_v41, %v644_v32 }
 0x163   : > { %746 = vmatmul.f32.gmra.mxu1 %v655_v42 }
 0x164   : > { %769 = vmatmul.f32.gmra.mxu3 %v656_v43 }
 0x16b   : > { %792 = vmatmul.f32.vlgmr.msrb.gmra.mxu1 %v655_v42 }
 0x16c   : > { %815 = vmatmul.f32.vlgmr.msrb.gmra.mxu3 %v656_v43 }
 0x1d8   : > { %v744_v45 = vpop.f32.mrf.mxu1  ;;  %v790_v48 = vpop.f32.mrf.mxu0 }
 0x1d9   : > { %v745_v49 = vadd.f32 %v744_v45, %v723_v46  ;;  %v791_v50 = vadd.f32 %v790_v48, %v724_v47 }
 0x1df   : > { %v767_v51 = vpop.f32.mrf.mxu3  ;;  %v813_v52 = vpop.f32.mrf.mxu2 }
 0x1e0   : > { %v768_v53 = vadd.f32 %v767_v51, %v745_v49  ;;  %v814_v54 = vadd.f32 %v813_v52, %v791_v50  ;;  %v747_v57 = vpop.f32.mrf.mxu1 }
 0x1e1   : > { %v748_v61 = vadd.f32 %v747_v57, %v723_v46 }
 0x1e2   : > { %v819_v58 = vmul.f32 0.5, %v768_v53  ;;  %v820_v59 = vmul.f32 0.5, %v814_v54 }
 0x1e4   : > { %1043 = vtanh.f32 %v819_v58 }
 0x1e5   : > { %1045 = vtanh.f32 %v820_v59 }
 0x1e7   : > { %v770_v63 = vpop.f32.mrf.mxu3 }
 0x1e8   : > { %v771_v0 = vadd.f32 %v770_v63, %v748_v61  ;;  %v793_v1 = vpop.f32.mrf.mxu1 }
 0x1e9   : > { %v794_v5 = vadd.f32 %v793_v1, %v724_v47 }
 0x1ea   : > { %v1044_v55 = vpop.eup %1043  ;;  %v821_v56 = vmul.f32 0.5, %v771_v0 }
 0x1eb   : > { %v1046_v60 = vpop.eup %1045  ;;  %v827_v62 = vadd.f32 1.0, %v1044_v55 }
 0x1ec   : > { %v828_v2 = vadd.f32 1.0, %v1046_v60  ;;  %1047 = vtanh.f32 %v821_v56 }
 0x1ed   : > { %v831_v3 = vmul.f32 %v827_v62, %v819_v58 }
 0x1ee   : > { %v832_v4 = vmul.f32 %v828_v2, %v820_v59 }
 0x1ef   : > { %835 = vst [vmem:[%s289_s18] sm:$0xff] %v831_v3  ;;  %v816_v6 = vpop.f32.mrf.mxu3 }
 0x1f0   : > { %836 = vst [vmem:[%s289_s18 + $0x8] sm:$0xff] %v832_v4  ;;  %v817_v7 = vadd.f32 %v816_v6, %v794_v5 }
 0x1f2   : > { %v1048_v8 = vpop.eup %1047  ;;  %v822_v9 = vmul.f32 0.5, %v817_v7 }
 0x1f3   : > { %v829_v10 = vadd.f32 1.0, %v1048_v8 }
 0x1f4   : > { %1049 = vtanh.f32 %v822_v9 }
 0x1f5   : > { %v833_v11 = vmul.f32 %v829_v10, %v821_v56 }
 0x1f7   : > { %837 = vst [vmem:[%s289_s18 + $0x10] sm:$0xff] %v833_v11 }
 0x1fa   : > { %v1050_v12 = vpop.eup %1049 }
 0x1fb   : > { %v830_v13 = vadd.f32 1.0, %v1050_v12  ;;  %846 = sbr.rel (!%p1207_p5) target bundleno = 544 (0x220), region = 52 }
 0x1fd   : > { %v834_v14 = vmul.f32 %v830_v13, %v822_v9 }
 0x1ff   : > { %838 = vst [vmem:[%s289_s18 + $0x18] sm:$0xff] %v834_v14 }
 0x200   : > { %s1833_s21 = smov (!%p849_p11, %s848_s21), 2 }
 0x201   : > { %s952_s23 = sshll.u32 %s1833_s21, 4 }
 0x202   : > { %s853_s29 = ssub.s32 32, %s952_s23 }
 0x203   : > { %s854_s8 = sshll.u32 %s853_s29, 4 }
 0x204   : > { %855 = vsyncadd %s1755_s20, %s854_s8  ;;  %p1764_p12 = scmp.ne.s32.totalorder %s952_s23, 0  ;;  %s954_s11 = sshll.u32 %s1190_s28, 5 }
 0x205   : > { %s859_s19 = scalar_lea.hbm %s1822_s7, %s954_s11  ;;  %s861_s22 = sshll.u32 %s289_s18, 4  ;;  %s1772_s22 = int_to_ptr.vmem [resolvable:$true] %s861_s22 }
 0x206   : > { %s863_s16 = sshll.u32 %s859_s19, 4  ;;  %s1823_s17 = sshll.u32 %s1833_s21, 8  ;;  %s1774_s16 = int_to_ptr.hbm [resolvable:$true] %s863_s16 }
 0x207   : > { %s1051_s9 = sshra.s32 %s1772_s22, 4  ;;  %s1053_s23 = sshrl.u32 %s1823_s17, 4  ;;  %s1052_s9 = int_to_ptr.vmem [resolvable:$true] %s1051_s9 }
 0x208   : > { %s1058_s29 = scalar_lea.vmem %s1052_s9, %s1053_s23  ;;  %s1126_s28 = smov [#allocation2]  }
 0x209   : > { %p1059_p13 = scmp.ne.s32.totalorder %s1052_s9, %s1058_s29  ;;  %s1062_s8 = scalar_lea.vmem %s1126_s28, 64 }
 0x20a   : > { %p1064_p2 = scmp.lt.s32.totalorder %s1062_s8, %s1058_s29 }
 0x20b   : > { %p1060_p0 = pnand %p1059_p13, %p1764_p12 }
 0x20d   : > { %p1061_p1 = pneg %p1060_p0 }
 0x20f   : > { %p1066_p3 = pnand %p1064_p2, %p1061_p1 }
 0x211   : > { %1069 = shalt.err (!%p1066_p3)
}
 0x212   : > { %s1070_s18 = sshra.s32 %s1774_s16, 4  ;;  %s1081_s19 = scalar_lea.hbm %s1822_s7, 48  ;;  %s1071_s18 = int_to_ptr.hbm [resolvable:$true] %s1070_s18 }
 0x213   : > { %s1077_s11 = scalar_lea.hbm %s1071_s18, %s1053_s23  ;;  %p1082_p8 = scmp.lt.s32.totalorder %s1071_s18, %s1822_s7 }
 0x214   : > { %p1078_p4 = scmp.ne.s32.totalorder %s1071_s18, %s1077_s11  ;;  %p1083_p9 = scmp.lt.s32.totalorder %s1081_s19, %s1077_s11 }
 0x216   : > { %p1079_p5 = pnand %p1078_p4, %p1764_p12  ;;  %p1084_p10 = por %p1083_p9, %p1082_p8 }
 0x218   : > { %p1080_p7 = pneg %p1079_p5 }
 0x21a   : > { %p1085_p11 = pnand %p1084_p10, %p1080_p7 }
 0x21c   : > { %1088 = shalt.err (!%p1085_p11)
}
 0x21d   : > { %s1127_s29 = smov 256   ;;  %s1128_s23 = smov 16  }
 0x21e   : > { %s1827_s28 = sshll.u32 %s1833_s21, 8 }
 0x21f   : > { %869 = dma.vmem_to_hbm [thread:$0]  (%p1764_p12), %s1772_s22, %s1827_s28, %s1774_s16, %s1755_s20, %s1127_s29, %s1127_s29, %s1128_s23  }
 0x220 PF: > { %p992_p13 = scmp.ge.s32.totalorder %s1124_s27, 2  ;;  %s878_s17 = sand.u32 1, %s1112_s24  }
 0x221   : > { %s879_s8 = scalar_lea.sflag [#allocation3], %s878_s17 }
 0x222   : > { %p989_p0 = pnand %p992_p13, %p1211_p6 }
 0x224   : > { %p990_p1 = pneg %p989_p0 }
 0x226   : > { %1107 = dma.done.wait (%p990_p1), %s879_s8, 512  }
 0x227   : > { %1109 = vsyncadd (%p990_p1), %s879_s8, 4294966784  ;;  %p17_p2 = scmp.ge.s32.totalorder %s1194_s30, 4   ;;  %s1828_s24 = smov %s1116_s25 }
 0x228   : > { %s1829_s25 = smov %s1120_s26  ;;  %s1830_s26 = smov %s1205_s10 }
 0x229   : > { %s1831_s27 = smov %s1194_s30  ;;  %19 = sbr.rel (!%p17_p2) target bundleno = 3 (0x3), region = 83 }
 0x22e   :  { %885 = vsyncpa [#allocation3], 1 }
 0x22f   :  { %887 = vsyncpa [#allocation3 + $0x1], 1 }

</bundles_post_ra>
